<compile_context>
chip_gen: v7x
topology: tpu7x:2x2x1
jax: 0.10.0
libtpu: 0.0.40
codegen_flags: <defaults>
</compile_context>

<pallas_src>
import jax
import jax.numpy as jnp
from jax.experimental import pallas as pl
from jax.experimental.pallas import tpu as pltpu


def _split_unary_t_kernel(bel_ref, pot_ref, w1_ref, vp_ref, b2_ref, out_ref):
    bel = bel_ref[...]                                 # [tb, N] f32
    pot = pot_ref[...]                                 # [tb, N] f32
    n = bel.shape[1]

    # obj = (beliefs * pots).sum(dim=1)                -> [tb, 1]   (VPU + XLU)
    obj = jnp.sum(bel * pot, axis=1, keepdims=True)

    # h = softplus(concat(beliefs, pots) @ W1 + b1): two MXU pushes against the
    # static halves of W1 (same FLOPs as a fused contraction, no wrapper concat).
    h = (jnp.dot(bel, w1_ref[:n, :], preferred_element_type=jnp.float32)
         + jnp.dot(pot, w1_ref[n:, :], preferred_element_type=jnp.float32)
         + vp_ref[0:1, :])
    # numerically-stable softplus (EUP exp / log1p, no isnan/select filler)
    h = jnp.maximum(h, 0.0) + jnp.log1p(jnp.exp(-jnp.abs(h)))

    # second layer has output width 1: VPU multiply + lane reduce against w2^T.
    t = jnp.sum(h * vp_ref[1:2, :], axis=1, keepdims=True) + b2_ref[0]

    # Lane-dense store: [tb, 1] -> [1, tb].
    out_ref[...] = (obj + t).T


def _round_up(x, m):
    return ((x + m - 1) // m) * m


def _pick_batch_tile(batch, n_feat, max_tb=512, act_budget_bytes=8 << 20):
    """Largest batch tile <= max_tb whose double-buffered activation tiles
    (beliefs + pots, 2 buffers each) fit the budget; never larger than the
    8-aligned batch; floored at 8 (sublane tiling)."""
    tb = max_tb
    while tb > 8 and 4 * tb * n_feat * 4 > act_budget_bytes:
        tb //= 2
    tb = min(tb, _round_up(batch, 8))
    return max(tb, 8)


def split_unary_t_forward(beliefs, pots, w1, b1, w2, b2):
    """beliefs, pots: [B, N] f32; w1: [2N, H]; b1: [H]; w2: [H, 1]; b2: [1]."""
    B, N = beliefs.shape
    H = w1.shape[1]

    beliefs = beliefs.astype(jnp.float32)
    pots = pots.astype(jnp.float32)
    # Fuse the small per-feature vectors (b1 and w2^T) into one [2, H] operand.
    vp = jnp.stack([b1, w2[:, 0]], axis=0).astype(jnp.float32)           # [2, H]
    b2_s = jnp.asarray(b2, jnp.float32).reshape((1,))                    # -> SMEM

    tb = _pick_batch_tile(B, N)
    b_pad = _round_up(B, tb)
    if b_pad != B:
        pad = ((0, b_pad - B), (0, 0))
        beliefs = jnp.pad(beliefs, pad)
        pots = jnp.pad(pots, pad)
    grid_b = b_pad // tb

    # Explicit VMEM budget with headroom (double-buffered activations + W1).
    vmem_need = (4 * tb * N * 4          # beliefs + pots, double-buffered
                 + 2 * 2 * N * H * 4     # W1
                 + 2 * 2 * H * 4         # [b1; w2^T]
                 + 2 * tb * 4            # output row
                 + (1 << 20))            # slack
    vmem_limit = int(min(max(2 * vmem_need, 16 << 20), 48 << 20))

    out = pl.pallas_call(
        _split_unary_t_kernel,
        out_shape=jax.ShapeDtypeStruct((grid_b, tb), jnp.float32),
        grid=(grid_b,),
        in_specs=[
            pl.BlockSpec((tb, N), lambda i: (i, 0)),                     # beliefs
            pl.BlockSpec((tb, N), lambda i: (i, 0)),                     # pots
            pl.BlockSpec((2 * N, H), lambda i: (0, 0)),                  # W1 (whole)
            pl.BlockSpec((2, H), lambda i: (0, 0)),                      # [b1; w2^T]
            pl.BlockSpec(memory_space=pltpu.MemorySpace.SMEM),           # b2 scalar
        ],
        out_specs=pl.BlockSpec((1, tb), lambda i: (i, 0)),               # lane-dense
        compiler_params=pltpu.CompilerParams(
            dimension_semantics=("parallel",),
            vmem_limit_bytes=vmem_limit),
    )(beliefs, pots, w1.astype(jnp.float32), vp, b2_s)

    return out.reshape(-1)[:B]                                           # [B]


def reference_forward(beliefs, pots, w1, b1, w2, b2):
    obj = jnp.sum(beliefs * pots, axis=1)
    xcat = jnp.concatenate([beliefs, pots], axis=1)
    h = jax.nn.softplus(xcat @ w1 + b1)
    t = (h @ w2 + b2)[:, 0]
    return obj + t


if __name__ == "__main__":
    key = jax.random.PRNGKey(0)
    B, N, H = 8, 32, 64                        # batch, num_potentials, hidden

    kb, kp, k1, k2, k3, k4 = jax.random.split(key, 6)
    beliefs = jax.random.uniform(kb, (B, N), dtype=jnp.float32)
    pots = jax.random.normal(kp, (B, N), dtype=jnp.float32)

    # Deterministic synthetic parameters for the unary_t_model MLP.
    w1 = 0.05 * jax.random.normal(k1, (2 * N, H), dtype=jnp.float32)
    b1 = 0.01 * jax.random.normal(k2, (H,), dtype=jnp.float32)
    w2 = 0.05 * jax.random.normal(k3, (H, 1), dtype=jnp.float32)
    b2 = 0.01 * jax.random.normal(k4, (1,), dtype=jnp.float32)

    out = split_unary_t_forward(beliefs, pots, w1, b1, w2, b2)
    jax.block_until_ready(out)

    ref = reference_forward(beliefs, pots, w1, b1, w2, b2)
    assert out.shape == (B,)
    assert jnp.allclose(out, ref, atol=1e-4, rtol=1e-4), float(jnp.max(jnp.abs(out - ref)))
    print("KERNEL_OK")
</pallas_src>

<mosaic_0001>
module attributes {stable_mosaic.version = 11 : i64} {
  func.func @_split_unary_t_kernel(%arg0: i32, %arg1: memref<8x32xf32, #tpu.memory_space<vmem>>, %arg2: memref<8x32xf32, #tpu.memory_space<vmem>>, %arg3: memref<64x64xf32, #tpu.memory_space<vmem>>, %arg4: memref<2x64xf32, #tpu.memory_space<vmem>>, %arg5: memref<1xf32, #tpu.memory_space<smem>>, %arg6: memref<1x8xf32, #tpu.memory_space<vmem>>) attributes {dimension_semantics = [#tpu.dimension_semantics<parallel>], iteration_bounds = array<i64: 1>, scalar_prefetch = 0 : i64, scratch_operands = 0 : i64, tpu.core_type = #tpu.core_type<tc>, window_params = [{transform_indices = @transform_0, window_bounds = array<i64: 8, 32>}, {transform_indices = @transform_1, window_bounds = array<i64: 8, 32>}, {pipeline_mode = #tpu.pipeline_mode<synchronous>, transform_indices = @transform_2, window_bounds = array<i64: 64, 64>}, {pipeline_mode = #tpu.pipeline_mode<synchronous>, transform_indices = @transform_3, window_bounds = array<i64: 2, 64>}, {transform_indices = @transform_4, window_bounds = array<i64: 1>}, {transform_indices = @transform_5, window_bounds = array<i64: 1, 8>}]} {
    %c0 = arith.constant 0 : index
    %c0_0 = arith.constant 0 : index
    %0 = vector.load %arg1[%c0, %c0_0] : memref<8x32xf32, #tpu.memory_space<vmem>>, vector<8x32xf32>
    %c0_1 = arith.constant 0 : index
    %c0_2 = arith.constant 0 : index
    %1 = vector.load %arg2[%c0_1, %c0_2] : memref<8x32xf32, #tpu.memory_space<vmem>>, vector<8x32xf32>
    %2 = arith.mulf %0, %1 : vector<8x32xf32>
    %cst = arith.constant dense<0.000000e+00> : vector<8xf32>
    %3 = vector.multi_reduction <add>, %2, %cst [1] : vector<8x32xf32> to vector<8xf32>
    %4 = vector.shape_cast %3 : vector<8xf32> to vector<8x1xf32>
    %c0_3 = arith.constant 0 : index
    %c0_4 = arith.constant 0 : index
    %5 = vector.load %arg3[%c0_3, %c0_4] : memref<64x64xf32, #tpu.memory_space<vmem>>, vector<32x64xf32>
    %cst_5 = arith.constant dense<0.000000e+00> : vector<8x64xf32>
    %6 = tpu.matmul %0, %5, %cst_5 {dimension_numbers = #tpu.dot_dimension_numbers<[1], [0], [0], [1], [0, 0, 1, 1], [], []>} : vector<8x32xf32>, vector<32x64xf32>, vector<8x64xf32> -> vector<8x64xf32>
    %c32 = arith.constant 32 : index
    %c0_6 = arith.constant 0 : index
    %7 = vector.load %arg3[%c32, %c0_6] : memref<64x64xf32, #tpu.memory_space<vmem>>, vector<32x64xf32>
    %cst_7 = arith.constant dense<0.000000e+00> : vector<8x64xf32>
    %8 = tpu.matmul %1, %7, %cst_7 {dimension_numbers = #tpu.dot_dimension_numbers<[1], [0], [0], [1], [0, 0, 1, 1], [], []>} : vector<8x32xf32>, vector<32x64xf32>, vector<8x64xf32> -> vector<8x64xf32>
    %9 = arith.addf %6, %8 : vector<8x64xf32>
    %c0_8 = arith.constant 0 : index
    %c0_9 = arith.constant 0 : index
    %10 = vector.load %arg4[%c0_8, %c0_9] : memref<2x64xf32, #tpu.memory_space<vmem>>, vector<1x64xf32>
    %11 = vector.broadcast %10 : vector<1x64xf32> to vector<8x64xf32>
    %12 = arith.addf %9, %11 : vector<8x64xf32>
    %cst_10 = arith.constant 0.000000e+00 : f32
    %13 = vector.broadcast %cst_10 : f32 to vector<8x64xf32>
    %14 = arith.maximumf %12, %13 : vector<8x64xf32>
    %15 = math.absf %12 : vector<8x64xf32>
    %cst_11 = arith.constant 0.000000e+00 : f32
    %16 = vector.broadcast %cst_11 : f32 to vector<8x64xf32>
    %17 = arith.subf %16, %15 : vector<8x64xf32>
    %18 = math.exp %17 : vector<8x64xf32>
    %19 = math.log1p %18 : vector<8x64xf32>
    %20 = arith.addf %14, %19 : vector<8x64xf32>
    %c1 = arith.constant 1 : index
    %c0_12 = arith.constant 0 : index
    %21 = vector.load %arg4[%c1, %c0_12] : memref<2x64xf32, #tpu.memory_space<vmem>>, vector<1x64xf32>
    %22 = vector.broadcast %21 : vector<1x64xf32> to vector<8x64xf32>
    %23 = arith.mulf %20, %22 : vector<8x64xf32>
    %cst_13 = arith.constant dense<0.000000e+00> : vector<8xf32>
    %24 = vector.multi_reduction <add>, %23, %cst_13 [1] : vector<8x64xf32> to vector<8xf32>
    %25 = vector.shape_cast %24 : vector<8xf32> to vector<8x1xf32>
    %c0_14 = arith.constant 0 : index
    %26 = memref.load %arg5[%c0_14] : memref<1xf32, #tpu.memory_space<smem>>
    %27 = vector.broadcast %26 : f32 to vector<8x1xf32>
    %28 = arith.addf %25, %27 : vector<8x1xf32>
    %29 = arith.addf %4, %28 : vector<8x1xf32>
    %30 = tpu.transpose %29, [1, 0] : vector<8x1xf32> -> vector<1x8xf32>
    %c0_15 = arith.constant 0 : index
    %c0_16 = arith.constant 0 : index
    %31 = vector.load %arg6[%c0_15, %c0_16] : memref<1x8xf32, #tpu.memory_space<vmem>>, vector<1x8xf32>
    tpu.vector_store %arg6[%c0_15, %c0_16], %30 {strides = array<i32>} : memref<1x8xf32, #tpu.memory_space<vmem>>, vector<1x8xf32>,
    return
  }
  func.func @transform_0(%arg0: i32) -> (i32, i32) {
    %c0_i32 = arith.constant 0 : i32
    %c0_i32_0 = arith.constant 0 : i32
    return %arg0, %c0_i32 : i32, i32
  }
  func.func @transform_1(%arg0: i32) -> (i32, i32) {
    %c0_i32 = arith.constant 0 : i32
    %c0_i32_0 = arith.constant 0 : i32
    return %arg0, %c0_i32 : i32, i32
  }
  func.func @transform_2(%arg0: i32) -> (i32, i32) {
    %c0_i32 = arith.constant 0 : i32
    %c0_i32_0 = arith.constant 0 : i32
    %c0_i32_1 = arith.constant 0 : i32
    return %c0_i32, %c0_i32_0 : i32, i32
  }
  func.func @transform_3(%arg0: i32) -> (i32, i32) {
    %c0_i32 = arith.constant 0 : i32
    %c0_i32_0 = arith.constant 0 : i32
    %c0_i32_1 = arith.constant 0 : i32
    return %c0_i32, %c0_i32_0 : i32, i32
  }
  func.func @transform_4(%arg0: i32) -> i32 {
    %c0_i32 = arith.constant 0 : i32
    %c0_i32_0 = arith.constant 0 : i32
    return %c0_i32 : i32
  }
  func.func @transform_5(%arg0: i32) -> (i32, i32) {
    %c0_i32 = arith.constant 0 : i32
    %c0_i32_0 = arith.constant 0 : i32
    return %arg0, %c0_i32 : i32, i32
  }
}

</mosaic_0001>

<bundles_post_ra>
// kernel: tpu_custom_call.1
= control target key start
LH: loop header
LB: loop body
LE: loop exit
PB: predicated region body
PF: predicated region fallthrough
CT: control target
= control target key end

     0   :  { %11 = vsyncpa [#allocation4], 0  ;;  %s559_s0 = inlined_call_operand.hbm [shape: f32[8,32], index: 0, kind: input, shape index: {}]   ;;  %s560_s1 = inlined_call_operand.hbm [shape: f32[8,32], index: 1, kind: input, shape index: {}]   ;;  %s561_s2 = inlined_call_operand.hbm [shape: f32[64,64], index: 2, kind: input, shape index: {}]   ;;  %s562_s3 = inlined_call_operand.vmem [shape: f32[2,64], index: 3, kind: input, shape index: {}]   ;;  %s563_s4 = inlined_call_operand.<no memory space> [shape: f32[1], index: 4, kind: input, shape index: {}]   ;;  %s564_s5 = inlined_call_operand.hbm [shape: f32[1,8], index: 5, kind: output, shape index: {}]  }
   0x1   :  { %12 = vsyncpa [#allocation7], 0 }
   0x2   :  { %13 = vsyncpa [#allocation5], 0  ;;  %s460_s18 = smov [#allocation6]   ;;  %s461_s20 = smov [#allocation3]  }
   0x3   :  { %s30_s19 = sshll.u32 %s460_s18, 4  ;;  %s20_s21 = sshll.u32 %s461_s20, 4  ;;  %s31_s19 = int_to_ptr.vmem [resolvable:$true] %s30_s19  ;;  %s21_s21 = int_to_ptr.vmem [resolvable:$true] %s20_s21 }
   0x4   :  { %s366_s24 = scalar_lea.hbm %s560_s1, 128 }
   0x5   :  { %p367_p0 = scmp.ne.s32.totalorder %s560_s1, %s366_s24  ;;  %p370_p1 = scmp.lt.u32.totalorder %s366_s24, %s560_s1 }
   0x7   :  { %p372_p2 = pnand %p370_p1, %p367_p0 }
   0x9   :  { %375 = shalt.err (!%p372_p2)
}
   0xa   :  { %s376_s29 = scalar_lea.vmem %s31_s19, 128  ;;  %p381_p4 = scmp.lt.s32.totalorder %s31_s19, %s31_s19 }
   0xb   :  { %p377_p3 = scmp.ne.s32.totalorder %s31_s19, %s376_s29  ;;  %p382_p5 = scmp.lt.s32.totalorder %s376_s29, %s376_s29 }
   0xd   :  { %p383_p6 = por %p382_p5, %p381_p4 }
   0xf   :  { %p384_p7 = pnand %p383_p6, %p377_p3 }
  0x11   :  { %387 = shalt.err (!%p384_p7)
}
  0x12   :  { %33 = dma.hbm_to_vmem [thread:$0]  %s560_s1, 128, %s31_s19, [#allocation7]  }
  0x13   :  { %s388_s9 = scalar_lea.hbm %s559_s0, 128 }
  0x14   :  { %p389_p8 = scmp.ne.s32.totalorder %s559_s0, %s388_s9  ;;  %p392_p9 = scmp.lt.u32.totalorder %s388_s9, %s559_s0 }
  0x16   :  { %p394_p10 = pnand %p392_p9, %p389_p8 }
  0x18   :  { %397 = shalt.err (!%p394_p10)
}
  0x19   :  { %s398_s14 = scalar_lea.vmem %s21_s21, 128  ;;  %p403_p12 = scmp.lt.s32.totalorder %s21_s21, %s21_s21 }
  0x1a   :  { %p399_p11 = scmp.ne.s32.totalorder %s21_s21, %s398_s14  ;;  %p404_p13 = scmp.lt.s32.totalorder %s398_s14, %s398_s14 }
  0x1c   :  { %p405_p0 = por %p404_p13, %p403_p12 }
  0x1e   :  { %p406_p1 = pnand %p405_p0, %p399_p11 }
  0x20   :  { %409 = shalt.err (!%p406_p1)
}
  0x21   :  { %23 = dma.hbm_to_vmem [thread:$0]  %s559_s0, 128, %s21_s21, [#allocation4]  }
  0x22   :  { %s462_s16 = smov [#allocation8]   ;;  %s410_s20 = scalar_lea.hbm %s561_s2, 1024 }
  0x23   :  { %s39_s17 = sshll.u32 %s462_s16, 4  ;;  %p411_p2 = scmp.ne.s32.totalorder %s561_s2, %s410_s20  ;;  %s40_s17 = int_to_ptr.vmem [resolvable:$true] %s39_s17 }
  0x24   :  { %p414_p3 = scmp.lt.u32.totalorder %s410_s20, %s561_s2 }
  0x26   :  { %p416_p4 = pnand %p414_p3, %p411_p2 }
  0x28   :  { %419 = shalt.err (!%p416_p4)
}
  0x29   :  { %s420_s26 = scalar_lea.vmem %s40_s17, 1024  ;;  %p425_p6 = scmp.lt.s32.totalorder %s40_s17, %s40_s17 }
  0x2a   :  { %p421_p5 = scmp.ne.s32.totalorder %s40_s17, %s420_s26  ;;  %p426_p7 = scmp.lt.s32.totalorder %s420_s26, %s420_s26 }
  0x2c   :  { %p427_p8 = por %p426_p7, %p425_p6 }
  0x2e   :  { %p428_p9 = pnand %p427_p8, %p421_p5 }
  0x30   :  { %431 = shalt.err (!%p428_p9)
}
  0x31   :  { %s463_s0 = smov 128   ;;  %s464_s21 = smov 8  }
  0x32   :  { %45 = dma.hbm_to_vmem [thread:$0]  %s561_s2, 1024, %s40_s17, [#allocation7], %s463_s0, %s463_s0, %s464_s21  }
  0x33   :  { %454 = dma.done.wait [#allocation4], 128  }
  0x34   :  { %455 = vsyncadd [#allocation4], 4294967168 }
  0x35   :  { %456 = dma.done.wait [#allocation7], 1152  }
  0x36   :  { %457 = vsyncadd [#allocation7], 4294966144  ;;  %v465_v0 = vmov 0.0|0.0   ;;  %vm466_vm0 = vmmov 0   ;;  %v467_v1 = vmov 0.0   ;;  %v70_v2 = vld [vmem:[#allocation8 + $0x20] sm:$0xff]  ;;  %v252_v42 = vstv %s563_s4 }
  0x37   :  { %341 = vmatprep.subr.bf16.mxu0 %v465_v0  ;;  %347 = vmatprep.subr.bf16.mxu1 %v465_v0  ;;  %v71_v3 = vld [vmem:[#allocation8 + $0x28] sm:$0xff]  ;;  %v66_v4 = vld [vmem:[#allocation8] sm:$0xff]  ;;  %v72_v7 = vld [vmem:[#allocation8 + $0x30] sm:$0xff]  ;;  %vm62_vm1 = vcmask 261120   ;;  %vm247_vm3 = vcmask 523264   ;;  %s468_s9 = smov [#allocation9]  }
  0x38   :  { %327 = vmatprep.mubr.msk.f32.mxu0 %vm466_vm0, %v467_v1  ;;  %338 = vmatprep.mubr.msk.f32.mxu1 %vm466_vm0, %v467_v1  ;;  %v342_v5 = vpack.c.bf16 %v71_v3, %v70_v2  ;;  %v67_v6 = vld [vmem:[#allocation8 + $0x8] sm:$0xff]  ;;  %v73_v8 = vld [vmem:[#allocation8 + $0x38] sm:$0xff]  ;;  %v68_v10 = vld [vmem:[#allocation8 + $0x10] sm:$0xff]  ;;  %vm287_vm4 = vcmask 57344  }
  0x39   :  { %v348_v9 = vpack.c.bf16 %v67_v6, %v66_v4  ;;  %v69_v11 = vld [vmem:[#allocation8 + $0x18] sm:$0xff]  ;;  %v345_v12 = vpack.c.bf16 %v73_v8, %v72_v7  ;;  %v59_v15 = vld [vmem:[#allocation3] sm:$0xff] }
  0x3a   :  { %343 = vmatpush3.bf16.msra.mxu0 %v342_v5  ;;  %v351_v13 = vpack.c.bf16 %v69_v11, %v68_v10  ;;  %v60_v14 = vld [vmem:[#allocation6] sm:$0xff]  ;;  %v307_v18 = vld [vmem:[%s562_s3] ss:$0 sm:$0xff]  ;;  %v308_v36 = vld [vmem:[%s562_s3 + $0x1] ss:$0 sm:$0xff]  ;;  %s295_s3 = sshll.u32 %s468_s9, 4  ;;  %s296_s3 = int_to_ptr.vmem [resolvable:$true] %s295_s3 }
  0x3b   :  { %349 = vmatpush3.bf16.msra.mxu1 %v348_v9  ;;  %344 = vmatprep.subr.bf16.mxu0 %v465_v0  ;;  %v61_v39 = vmul.f32 %v60_v14, %v59_v15  ;;  %s432_s10 = scalar_lea.vmem %s296_s3, 16  ;;  %s436_s11 = scalar_lea.vmem %s296_s3, 32 }
  0x3c   :  { %350 = vmatprep.subr.bf16.mxu1 %v465_v0  ;;  %p433_p10 = scmp.ne.s32.totalorder %s296_s3, %s432_s10  ;;  %p437_p11 = scmp.lt.s32.totalorder %s296_s3, %s296_s3 }
  0x3d   :  { %v63_v41 = vsel %vm62_vm1, %v61_v39, 0.0  ;;  %p438_p12 = scmp.lt.s32.totalorder %s436_s11, %s432_s10 }
  0x3e   :  { %346 = vmatpush3.bf16.msra.mxu0 %v345_v12 }
  0x3f   :  { %352 = vmatpush3.bf16.msra.mxu1 %v351_v13  ;;  %p439_p13 = por %p438_p12, %p437_p11 }
  0x41   :  { %328 = vmatmul.mubr.msk.f32.vlgmr.msra.gmra.mrb[0].mxu0 %vm62_vm1, %v60_v14  ;;  %p440_p0 = pnand %p439_p13, %p433_p10 }
  0x42   :  { %339 = vmatmul.mubr.msk.f32.vlgmr.msra.gmra.mrb[0].mxu1 %vm62_vm1, %v59_v15 }
 0x114   :  { %v143_v16 = vpop.f32.mrb[0].mxu0 }
 0x115   :  { %v216_v17 = vpop.f32.mrb[0].mxu1  ;;  %v329_v19 = vpop.f32.mrb[1].mxu0 }
 0x116   :  { %v217_v20 = vadd.f32 %v216_v17, %v143_v16  ;;  %v340_v21 = vpop.f32.mrb[1].mxu1 }
 0x118   :  { %v225_v22 = vadd.f32 %v307_v18, %v217_v20 }
 0x11a   :  { %v227_v23 = vand.u32 2147483647, %v225_v22  ;;  %v226_v34 = vmax.f32 %v225_v22, 0.0 }
 0x11c   :  { %v228_v24 = vsub.f32 0.0, %v227_v23 }
 0x11e   :  { %v229_v25 = vmul.f32 1.442695, %v228_v24 }
 0x120   :  { %362 = vpow2.f32 %v229_v25 }
 0x12a   :  { %v363_v26 = vpop.eup %362 }
 0x12b   :  { %v231_v27 = vadd.f32 1.0, %v363_v26  ;;  %v234_v28 = vmul.f32 -0.5, %v363_v26  ;;  %v237_v30 = vand.u32 2147483647, %v363_v26 }
 0x12d   :  { %364 = vlog2.f32 %v231_v27  ;;  %v235_v29 = vadd.f32 1.0, %v234_v28  ;;  %vm238_vm2 = vcmp.lt.f32.partialorder %v237_v30, 0.0004427343 }
 0x12f   :  { %v236_v33 = vmul.f32 %v363_v26, %v235_v29 }
 0x137   :  { %v365_v31 = vpop.eup %364 }
 0x138   :  { %v233_v32 = vmul.f32 0.6931472, %v365_v31 }
 0x13a   :  { %v239_v35 = vsel %vm238_vm2, %v236_v33, %v233_v32 }
 0x13b   :  { %v240_v37 = vadd.f32 %v239_v35, %v226_v34 }
 0x13d   :  { %v246_v38 = vmul.f32 %v308_v36, %v240_v37 }
 0x13f   :  { %v248_v40 = vsel %vm247_vm3, %v246_v38, 0.0 }
 0x140   :  { %249 = vadd.xlane.f32.xlu0 %v248_v40 }
 0x144   :  { %64 = vadd.xlane.f32.xlu0 %v63_v41 }
 0x1cd   :  { %v250_v43 = vpop.xlane.xlu0 %249 }
 0x1ce   :  { %v253_v44 = vadd.f32 %v252_v42, %v250_v43 }
 0x1d1   :  { %v65_v45 = vpop.xlane.xlu0 %64 }
 0x1d2   :  { %v254_v46 = vadd.f32 %v253_v44, %v65_v45 }
 0x1d4   :  { %255 = vxpose.xlu1.b32.start.end [1/1] (short) (narrow) %v254_v46, 8 }
 0x254   :  { %v271_v47 = vpop.trf.xlu1 }
 0x255   :  { %288 = vst.msk [vmem:[#allocation9] sm:$0x1] %vm287_vm4, %v271_v47 }
 0x256   :  { %443 = shalt.err (!%p440_p0)
}
 0x257   :  { %s444_s13 = scalar_lea.hbm %s564_s5, 16 }
 0x258   :  { %p445_p1 = scmp.ne.s32.totalorder %s564_s5, %s444_s13  ;;  %p448_p2 = scmp.lt.u32.totalorder %s444_s13, %s564_s5 }
 0x25a   :  { %p450_p3 = pnand %p448_p2, %p445_p1 }
 0x25c   :  { %453 = shalt.err (!%p450_p3)
}
 0x25d   :  { %298 = dma.vmem_to_hbm [thread:$0]  %s296_s3, 16, %s564_s5, [#allocation5]  }
 0x25e   :  { %458 = dma.done.wait [#allocation5], 16  }
 0x25f   :  { %459 = vsyncadd [#allocation5], 4294967280 }
 0x260   :  { %302 = vsyncpa [#allocation4], 1 }
 0x261   :  { %303 = vsyncpa [#allocation7], 1 }
 0x262   :  { %304 = vsyncpa [#allocation5], 1 }

</bundles_post_ra>
